<compile_context>
chip_gen: v7x
topology: tpu7x:2x2x1
jax: 0.10.0
libtpu: 0.0.40
codegen_flags: <defaults>
</compile_context>

<pallas_src>
import functools

import jax
import jax.numpy as jnp
from jax.experimental import pallas as pl
from jax.experimental.pallas import tpu as pltpu

_LANE = 128      # lane width: last-dim tiles must be multiples of this
_SUBLANE = 8     # sublane width: second-to-last-dim tiles multiples of this


def _round_up(x, m):
    return (x + m - 1) // m * m


def _pick_tile(n, target, align):
    """Largest tile <= target that divides n and is a multiple of `align`,
    falling back to the full dimension (full-extent blocks are always legal)."""
    t = min(target, n)
    t -= t % align
    while t >= align:
        if n % t == 0:
            return t
        t -= align
    return n


def _pad_axis(a, axis, new_size):
    pad = new_size - a.shape[axis]
    if pad == 0:
        return a
    widths = [(0, 0)] * a.ndim
    widths[axis] = (0, pad)
    return jnp.pad(a, widths)


def _vmem_capacity_bytes():
    try:
        info = pltpu.get_tpu_info()
        return int(getattr(info, "vmem_capacity_bytes", 64 * 2 ** 20))
    except Exception:
        return 64 * 2 ** 20          # conservative: v7x per-TensorCore size


def _is_v5e():
    try:
        kind = jax.devices()[0].device_kind.lower()
        return ("v5 lite" in kind) or ("v5e" in kind) or ("v5litepod" in kind)
    except Exception:
        return False


def _vmem_limit_bytes(td, ts, din, dout, num_relations, adj_buffers, premixed):
    """Scoped-VMEM request: estimated footprint with headroom, capped well
    below the smallest physical VMEM (v7x: 64 MiB/TC)."""
    adj_bytes = max(adj_buffers, 2) * num_relations * td * ts * 2   # bf16
    if premixed:
        stream = (adj_bytes
                  + 2 * td * dout * 4                 # root term (f32)
                  + 2 * num_relations * ts * dout * 2)  # premixed H_r (bf16)
    else:
        stream = (adj_bytes
                  + 2 * td * dout * 4                 # root term (f32)
                  + 2 * ts * din * 2                  # x src tile (bf16)
                  + 2 * num_relations * din * dout * 4)  # relation weights
    resident = td * dout * 4                          # output accumulator
    need = 2 * (stream + resident)                    # Mosaic scratch headroom
    cap = min(48 * 2 ** 20, int(0.75 * _vmem_capacity_bytes()))
    assert adj_bytes + resident <= cap, (
        "adjacency tile does not fit the scoped-VMEM budget; reduce "
        "tile_dst/tile_src or pad num_nodes to a tileable size")
    return int(min(max(need, 16 * 2 ** 20), cap))


# ----------------------------------------------------------------------------
# Pallas kernels: one RGCN conv layer.
# grid = (dst_node_tiles [parallel], src_node_tiles [arbitrary])
# The output block is the resident accumulator over the src axis.
# ----------------------------------------------------------------------------
def _store(out_ref, acc, apply_relu, k):
    if apply_relu:
        last = pl.num_programs(1) - 1

        @pl.when(k != last)
        def _():
            out_ref[...] = acc

        @pl.when(k == last)
        def _():
            out_ref[...] = jnp.maximum(acc, 0.0)
    else:
        out_ref[...] = acc


def _rgcn_kernel_adj_first(root_ref, x_src_ref, adj_ref, w_rel_ref, out_ref,
                           *, num_relations, apply_relu):
    """out[i] += sum_r (A_r[i, k] @ x[k]) @ W_r   (init with root term)."""
    k = pl.program_id(1)

    @pl.when(k == 0)
    def _():
        out_ref[...] = root_ref[...]

    x_src = x_src_ref[...]                       # (ts, din)  bf16
    acc = out_ref[...]                           # f32, resident output block
    for r in range(num_relations):               # statically unrolled
        ax = jnp.dot(adj_ref[r], x_src, preferred_element_type=jnp.float32)
        acc = acc + jnp.dot(ax, w_rel_ref[r],
                            preferred_element_type=jnp.float32)

    _store(out_ref, acc, apply_relu, k)


def _rgcn_kernel_premixed(root_ref, h_src_ref, adj_ref, out_ref,
                          *, num_relations, apply_relu):
    """out[i] += sum_r A_r[i, k] @ H_r[k],  H_r = x @ W_r precomputed."""
    k = pl.program_id(1)

    @pl.when(k == 0)
    def _():
        out_ref[...] = root_ref[...]

    acc = out_ref[...]
    for r in range(num_relations):
        acc = acc + jnp.dot(adj_ref[r], h_src_ref[r],
                            preferred_element_type=jnp.float32)

    _store(out_ref, acc, apply_relu, k)


def rgcn_conv(x, w_rel, w_root, bias, adj, *, apply_relu=False,
              tile_dst=256, tile_src=2048, adj_buffers=2):
    """One RGCNConv layer (mean aggregation per relation).

    x      : (N, D_in)        float32
    w_rel  : (R, D_in, D_out) float32   (D_out must be a multiple of 128)
    w_root : (D_in, D_out)
    bias   : (1, D_out)
    adj    : (R, N, N)  normalized adjacency, adj[r, dst, src] (any float dtype)
    """
    N, din = x.shape
    R, din_w, dout = w_rel.shape
    assert R >= 1 and din_w == din
    assert adj.shape == (R, N, N)
    assert w_root.shape == (din, dout)
    assert bias.shape == (1, dout)
    assert dout % _LANE == 0, "pad D_out to the 128-lane width (lane-dense vst)"

    # dst tile: keep n_dst >= 2 so the 'parallel' axis can shard across the
    # two TensorCores of a v7x chip (one extra grid step elsewhere: negligible).
    td_target = min(tile_dst, N // 2) if N // 2 >= _SUBLANE else N
    td = _pick_tile(N, max(td_target, _SUBLANE), _SUBLANE)
    # src (contraction) tile: prefer 256-aligned (v6e/v7x MXU depth), fall back
    # to 128-aligned, then the full extent.
    ts = _pick_tile(N, tile_src, 2 * _LANE)
    if ts == N and N % (2 * _LANE) != 0:
        ts = _pick_tile(N, tile_src, _LANE)
    n_dst, n_src = N // td, N // ts

    # Association order based on LANE-PADDED dims (an N=8 matmul costs the same
    # MXU passes as N=128): prefer (A@X)@W unless padded D_out < padded D_in.
    premixed = _round_up(dout, _LANE) < _round_up(din, _LANE)

    hi = jax.lax.Precision.HIGHEST
    # Root/self term precomputed once (removes x_dst / W_root / bias inputs).
    root = (jnp.dot(x, w_root, precision=hi) + bias).astype(jnp.float32)
    # Streamed operands in bf16 (halves the dominant HBM traffic, 2-4x MXU).
    adj = adj.astype(jnp.bfloat16)

    vlim = _vmem_limit_bytes(td, ts, din, dout, R, adj_buffers, premixed)

    adj_index_map = lambda i, k: (0, i, k)
    adj_spec = pl.BlockSpec((R, td, ts), adj_index_map)
    if adj_buffers > 2 and hasattr(pl, "Buffered"):
        try:   # deeper pipelining for DMA-bound passes (v5e layer 1)
            adj_spec = pl.BlockSpec((R, td, ts), adj_index_map,
                                    pipeline_mode=pl.Buffered(adj_buffers))
        except TypeError:
            pass
    root_spec = pl.BlockSpec((td, dout), lambda i, k: (i, 0))
    out_spec = pl.BlockSpec((td, dout), lambda i, k: (i, 0))

    if premixed:
        # Precompute H_r = x @ W_r ONCE per layer (depends only on the src
        # tile; doing it in-kernel would recompute it for every dst tile).
        h_rel = jnp.einsum("nd,rdk->rnk", x, w_rel,
                           precision=hi).astype(jnp.bfloat16)
        kernel = functools.partial(_rgcn_kernel_premixed, num_relations=R,
                                   apply_relu=apply_relu)
        in_specs = [root_spec,
                    pl.BlockSpec((R, ts, dout), lambda i, k: (0, k, 0)),
                    adj_spec]
        operands = (root, h_rel, adj)
    else:
        kernel = functools.partial(_rgcn_kernel_adj_first, num_relations=R,
                                   apply_relu=apply_relu)
        in_specs = [root_spec,
                    pl.BlockSpec((ts, din), lambda i, k: (k, 0)),
                    adj_spec,
                    pl.BlockSpec((R, din, dout), lambda i, k: (0, 0, 0))]
        operands = (root, x.astype(jnp.bfloat16), adj, w_rel)

    return pl.pallas_call(
        kernel,
        out_shape=jax.ShapeDtypeStruct((N, dout), jnp.float32),
        grid_spec=pltpu.PrefetchScalarGridSpec(
            num_scalar_prefetch=0,
            grid=(n_dst, n_src),
            in_specs=in_specs,
            out_specs=out_spec,
        ),
        compiler_params=pltpu.CompilerParams(
            dimension_semantics=("parallel", "arbitrary"),
            vmem_limit_bytes=vlim),
    )(*operands)


# ----------------------------------------------------------------------------
# Glue: densify edge list into normalized per-relation adjacency.
# ----------------------------------------------------------------------------
def build_norm_adj(edge_index, edge_type, num_nodes, num_relations,
                   dtype=jnp.bfloat16):
    src, dst = edge_index[0], edge_index[1]
    adj = jnp.zeros((num_relations, num_nodes, num_nodes), jnp.float32)
    adj = adj.at[edge_type, dst, src].add(1.0)
    deg = adj.sum(axis=-1, keepdims=True)        # incoming degree per relation
    adj = adj / jnp.where(deg > 0, deg, 1.0)     # mean-aggregation norm
    return adj.astype(dtype)


# ----------------------------------------------------------------------------
# Full RGCN forward: conv1 -> ReLU -> dropout(eval) -> conv2
# ----------------------------------------------------------------------------
def rgcn_forward(params, node_features, edge_index, edge_type, num_relations,
                 *, tile_dst=256, tile_src=2048):
    N, _ = node_features.shape
    hid = params["w1_root"].shape[1]
    out_dim = params["w2_root"].shape[1]

    adj = build_norm_adj(edge_index, edge_type, N, num_relations)   # bf16

    # Zero-pad hidden/output feature dims to the 128-lane width so output
    # stores are lane-dense (unmasked vst).  Padding is mathematically exact.
    hid_p = _round_up(hid, _LANE)
    out_p = _round_up(out_dim, _LANE)

    w1_rel = _pad_axis(params["w1_rel"], 2, hid_p)
    w1_root = _pad_axis(params["w1_root"], 1, hid_p)
    b1 = _pad_axis(params["b1"], 1, hid_p)

    w2_rel = _pad_axis(_pad_axis(params["w2_rel"], 1, hid_p), 2, out_p)
    w2_root = _pad_axis(_pad_axis(params["w2_root"], 0, hid_p), 1, out_p)
    b2 = _pad_axis(params["b2"], 1, out_p)

    # Layer 1 has the lowest compute-per-byte (tiny D_in) -> on v5e (lowest
    # HBM bandwidth) deepen the adjacency pipeline to hide DMA jitter.
    adj_buffers1 = 3 if (_is_v5e() and hasattr(pl, "Buffered")) else 2

    h = rgcn_conv(node_features, w1_rel, w1_root, b1, adj,
                  apply_relu=True, tile_dst=tile_dst, tile_src=tile_src,
                  adj_buffers=adj_buffers1)
    # F.dropout(p=0.5, training=False) == identity (eval mode).
    out = rgcn_conv(h, w2_rel, w2_root, b2, adj,
                    apply_relu=False, tile_dst=tile_dst, tile_src=tile_src)
    return out[:, :out_dim]


# ----------------------------------------------------------------------------
# Pure-JAX reference (for correctness check)
# ----------------------------------------------------------------------------
def _conv_ref(x, w_rel, w_root, bias, adj):
    hi = jax.lax.Precision.HIGHEST
    out = jnp.dot(x, w_root, precision=hi) + bias
    h = jnp.einsum("jd,rdk->rjk", x, w_rel, precision=hi)
    return out + jnp.einsum("rij,rjk->ik", adj, h, precision=hi)


def _forward_ref(params, x, edge_index, edge_type, num_relations):
    adj = build_norm_adj(edge_index, edge_type, x.shape[0], num_relations,
                         dtype=jnp.float32)
    h = jnp.maximum(_conv_ref(x, params["w1_rel"], params["w1_root"],
                              params["b1"], adj), 0.0)
    return _conv_ref(h, params["w2_rel"], params["w2_root"],
                     params["b2"], adj)


if __name__ == "__main__":
    key = jax.random.PRNGKey(0)

    # Small shapes consistent with the module's forward (N large enough to
    # exercise both grid axes and megacore-friendly n_dst >= 2).
    num_nodes = 256
    num_edges = 2048
    input_dim, hidden_dim, output_dim = 8, 32, 16
    num_relations = 3

    ks = jax.random.split(key, 10)
    node_features = jax.random.normal(ks[0], (num_nodes, input_dim),
                                      dtype=jnp.float32)
    edge_index = jax.random.randint(ks[1], (2, num_edges), 0, num_nodes)
    edge_type = jax.random.randint(ks[2], (num_edges,), 0, num_relations)

    def init(k, shape, fan_in):
        return (jax.random.normal(k, shape, dtype=jnp.float32)
                / jnp.sqrt(jnp.float32(fan_in)))

    params = {
        "w1_rel":  init(ks[3], (num_relations, input_dim, hidden_dim), input_dim),
        "w1_root": init(ks[4], (input_dim, hidden_dim), input_dim),
        "b1":      jnp.zeros((1, hidden_dim), jnp.float32),
        "w2_rel":  init(ks[5], (num_relations, hidden_dim, output_dim), hidden_dim),
        "w2_root": init(ks[6], (hidden_dim, output_dim), hidden_dim),
        "b2":      jnp.zeros((1, output_dim), jnp.float32),
    }

    out = rgcn_forward(params, node_features, edge_index, edge_type,
                       num_relations)
    out = jax.block_until_ready(out)
    ref = jax.block_until_ready(
        _forward_ref(params, node_features, edge_index, edge_type,
                     num_relations))

    assert out.shape == (num_nodes, output_dim)
    # Tolerance covers the intentional bf16 adjacency/feature streaming plus
    # MXU rounding; bugs (wrong tiles / missing relations) are O(1) errors.
    max_diff = float(jnp.max(jnp.abs(out - ref)))
    assert jnp.allclose(out, ref, rtol=5e-2, atol=5e-2), (
        f"mismatch vs reference, max abs diff = {max_diff}")

    # Extra check: exercise the A @ (X.W_r) "premixed" path (chosen only when
    # the lane-padded D_out is smaller than the lane-padded D_in).
    x2 = jax.random.normal(ks[7], (num_nodes, 256), dtype=jnp.float32)
    w_rel2 = init(ks[8], (num_relations, 256, 128), 256)
    w_root2 = init(ks[9], (256, 128), 256)
    bias2 = jnp.zeros((1, 128), jnp.float32)
    adj_bf16 = build_norm_adj(edge_index, edge_type, num_nodes, num_relations)
    adj_f32 = build_norm_adj(edge_index, edge_type, num_nodes, num_relations,
                             dtype=jnp.float32)
    out2 = jax.block_until_ready(
        rgcn_conv(x2, w_rel2, w_root2, bias2, adj_bf16, apply_relu=False))
    ref2 = jax.block_until_ready(_conv_ref(x2, w_rel2, w_root2, bias2, adj_f32))
    max_diff2 = float(jnp.max(jnp.abs(out2 - ref2)))
    assert jnp.allclose(out2, ref2, rtol=5e-2, atol=5e-2), (
        f"premixed-path mismatch vs reference, max abs diff = {max_diff2}")

    print("KERNEL_OK")
</pallas_src>

<mosaic_0001>
module attributes {stable_mosaic.version = 11 : i64} {
  func.func @_rgcn_kernel_adj_first(%arg0: i32, %arg1: i32, %arg2: memref<128x128xf32, #tpu.memory_space<vmem>>, %arg3: memref<256x8xbf16, #tpu.memory_space<vmem>>, %arg4: memref<3x128x256xbf16, #tpu.memory_space<vmem>>, %arg5: memref<3x8x128xf32, #tpu.memory_space<vmem>>, %arg6: memref<128x128xf32, #tpu.memory_space<vmem>>) attributes {dimension_semantics = [#tpu.dimension_semantics<parallel>, #tpu.dimension_semantics<arbitrary>], iteration_bounds = array<i64: 2, 1>, scalar_prefetch = 0 : i64, scratch_operands = 0 : i64, tpu.core_type = #tpu.core_type<tc>, window_params = [{transform_indices = @transform_0, window_bounds = array<i64: 128, 128>}, {transform_indices = @transform_1, window_bounds = array<i64: 256, 8>}, {transform_indices = @transform_2, window_bounds = array<i64: 3, 128, 256>}, {pipeline_mode = #tpu.pipeline_mode<synchronous>, transform_indices = @transform_3, window_bounds = array<i64: 3, 8, 128>}, {transform_indices = @transform_4, window_bounds = array<i64: 128, 128>}]} {
    %c0_i32 = arith.constant 0 : i32
    %0 = arith.cmpi eq, %arg1, %c0_i32 : i32
    %1 = arith.extui %0 : i1 to i32
    %c0_i32_0 = arith.constant 0 : i32
    %2 = arith.cmpi ne, %1, %c0_i32_0 : i32
    scf.if %2 {
      %c0_29 = arith.constant 0 : index
      %c0_30 = arith.constant 0 : index
      %32 = vector.load %arg2[%c0_29, %c0_30] : memref<128x128xf32, #tpu.memory_space<vmem>>, vector<128x128xf32>
      %c0_31 = arith.constant 0 : index
      %c0_32 = arith.constant 0 : index
      %33 = vector.load %arg6[%c0_31, %c0_32] : memref<128x128xf32, #tpu.memory_space<vmem>>, vector<128x128xf32>
      tpu.vector_store %arg6[%c0_31, %c0_32], %32 {strides = array<i32>} : memref<128x128xf32, #tpu.memory_space<vmem>>, vector<128x128xf32>,
    } else {
    }
    %c0 = arith.constant 0 : index
    %c0_1 = arith.constant 0 : index
    %3 = vector.load %arg3[%c0, %c0_1] : memref<256x8xbf16, #tpu.memory_space<vmem>>, vector<256x8xbf16>
    %c0_2 = arith.constant 0 : index
    %c0_3 = arith.constant 0 : index
    %4 = vector.load %arg6[%c0_2, %c0_3] : memref<128x128xf32, #tpu.memory_space<vmem>>, vector<128x128xf32>
    %c0_4 = arith.constant 0 : index
    %c0_5 = arith.constant 0 : index
    %c0_6 = arith.constant 0 : index
    %5 = vector.load %arg4[%c0_4, %c0_5, %c0_6] : memref<3x128x256xbf16, #tpu.memory_space<vmem>>, vector<1x128x256xbf16>
    %6 = vector.shape_cast %5 : vector<1x128x256xbf16> to vector<128x256xbf16>
    %cst = arith.constant dense<0.000000e+00> : vector<128x8xf32>
    %7 = tpu.matmul %6, %3, %cst {dimension_numbers = #tpu.dot_dimension_numbers<[1], [0], [0], [1], [0, 0, 1, 1], [], []>} : vector<128x256xbf16>, vector<256x8xbf16>, vector<128x8xf32> -> vector<128x8xf32>
    %c0_7 = arith.constant 0 : index
    %c0_8 = arith.constant 0 : index
    %c0_9 = arith.constant 0 : index
    %8 = vector.load %arg5[%c0_7, %c0_8, %c0_9] : memref<3x8x128xf32, #tpu.memory_space<vmem>>, vector<1x8x128xf32>
    %9 = vector.shape_cast %8 : vector<1x8x128xf32> to vector<8x128xf32>
    %cst_10 = arith.constant dense<0.000000e+00> : vector<128x128xf32>
    %10 = tpu.matmul %7, %9, %cst_10 {dimension_numbers = #tpu.dot_dimension_numbers<[1], [0], [0], [1], [0, 0, 1, 1], [], []>} : vector<128x8xf32>, vector<8x128xf32>, vector<128x128xf32> -> vector<128x128xf32>
    %11 = arith.addf %4, %10 : vector<128x128xf32>
    %c1 = arith.constant 1 : index
    %c0_11 = arith.constant 0 : index
    %c0_12 = arith.constant 0 : index
    %12 = vector.load %arg4[%c1, %c0_11, %c0_12] : memref<3x128x256xbf16, #tpu.memory_space<vmem>>, vector<1x128x256xbf16>
    %13 = vector.shape_cast %12 : vector<1x128x256xbf16> to vector<128x256xbf16>
    %cst_13 = arith.constant dense<0.000000e+00> : vector<128x8xf32>
    %14 = tpu.matmul %13, %3, %cst_13 {dimension_numbers = #tpu.dot_dimension_numbers<[1], [0], [0], [1], [0, 0, 1, 1], [], []>} : vector<128x256xbf16>, vector<256x8xbf16>, vector<128x8xf32> -> vector<128x8xf32>
    %c1_14 = arith.constant 1 : index
    %c0_15 = arith.constant 0 : index
    %c0_16 = arith.constant 0 : index
    %15 = vector.load %arg5[%c1_14, %c0_15, %c0_16] : memref<3x8x128xf32, #tpu.memory_space<vmem>>, vector<1x8x128xf32>
    %16 = vector.shape_cast %15 : vector<1x8x128xf32> to vector<8x128xf32>
    %cst_17 = arith.constant dense<0.000000e+00> : vector<128x128xf32>
    %17 = tpu.matmul %14, %16, %cst_17 {dimension_numbers = #tpu.dot_dimension_numbers<[1], [0], [0], [1], [0, 0, 1, 1], [], []>} : vector<128x8xf32>, vector<8x128xf32>, vector<128x128xf32> -> vector<128x128xf32>
    %18 = arith.addf %11, %17 : vector<128x128xf32>
    %c2 = arith.constant 2 : index
    %c0_18 = arith.constant 0 : index
    %c0_19 = arith.constant 0 : index
    %19 = vector.load %arg4[%c2, %c0_18, %c0_19] : memref<3x128x256xbf16, #tpu.memory_space<vmem>>, vector<1x128x256xbf16>
    %20 = vector.shape_cast %19 : vector<1x128x256xbf16> to vector<128x256xbf16>
    %cst_20 = arith.constant dense<0.000000e+00> : vector<128x8xf32>
    %21 = tpu.matmul %20, %3, %cst_20 {dimension_numbers = #tpu.dot_dimension_numbers<[1], [0], [0], [1], [0, 0, 1, 1], [], []>} : vector<128x256xbf16>, vector<256x8xbf16>, vector<128x8xf32> -> vector<128x8xf32>
    %c2_21 = arith.constant 2 : index
    %c0_22 = arith.constant 0 : index
    %c0_23 = arith.constant 0 : index
    %22 = vector.load %arg5[%c2_21, %c0_22, %c0_23] : memref<3x8x128xf32, #tpu.memory_space<vmem>>, vector<1x8x128xf32>
    %23 = vector.shape_cast %22 : vector<1x8x128xf32> to vector<8x128xf32>
    %cst_24 = arith.constant dense<0.000000e+00> : vector<128x128xf32>
    %24 = tpu.matmul %21, %23, %cst_24 {dimension_numbers = #tpu.dot_dimension_numbers<[1], [0], [0], [1], [0, 0, 1, 1], [], []>} : vector<128x8xf32>, vector<8x128xf32>, vector<128x128xf32> -> vector<128x128xf32>
    %25 = arith.addf %18, %24 : vector<128x128xf32>
    %c0_i32_25 = arith.constant 0 : i32
    %26 = arith.cmpi ne, %arg1, %c0_i32_25 : i32
    %27 = arith.extui %26 : i1 to i32
    %c0_i32_26 = arith.constant 0 : i32
    %28 = arith.cmpi ne, %27, %c0_i32_26 : i32
    scf.if %28 {
      %c0_29 = arith.constant 0 : index
      %c0_30 = arith.constant 0 : index
      %32 = vector.load %arg6[%c0_29, %c0_30] : memref<128x128xf32, #tpu.memory_space<vmem>>, vector<128x128xf32>
      tpu.vector_store %arg6[%c0_29, %c0_30], %25 {strides = array<i32>} : memref<128x128xf32, #tpu.memory_space<vmem>>, vector<128x128xf32>,
    } else {
    }
    %c0_i32_27 = arith.constant 0 : i32
    %29 = arith.cmpi eq, %arg1, %c0_i32_27 : i32
    %30 = arith.extui %29 : i1 to i32
    %c0_i32_28 = arith.constant 0 : i32
    %31 = arith.cmpi ne, %30, %c0_i32_28 : i32
    scf.if %31 {
      %cst_29 = arith.constant 0.000000e+00 : f32
      %32 = vector.broadcast %cst_29 : f32 to vector<128x128xf32>
      %33 = arith.maximumf %25, %32 : vector<128x128xf32>
      %c0_30 = arith.constant 0 : index
      %c0_31 = arith.constant 0 : index
      %34 = vector.load %arg6[%c0_30, %c0_31] : memref<128x128xf32, #tpu.memory_space<vmem>>, vector<128x128xf32>
      tpu.vector_store %arg6[%c0_30, %c0_31], %33 {strides = array<i32>} : memref<128x128xf32, #tpu.memory_space<vmem>>, vector<128x128xf32>,
    } else {
    }
    return
  }
  func.func @transform_0(%arg0: i32, %arg1: i32) -> (i32, i32) {
    %c0_i32 = arith.constant 0 : i32
    %c0_i32_0 = arith.constant 0 : i32
    return %arg0, %c0_i32 : i32, i32
  }
  func.func @transform_1(%arg0: i32, %arg1: i32) -> (i32, i32) {
    %c0_i32 = arith.constant 0 : i32
    %c0_i32_0 = arith.constant 0 : i32
    return %arg1, %c0_i32 : i32, i32
  }
  func.func @transform_2(%arg0: i32, %arg1: i32) -> (i32, i32, i32) {
    %c0_i32 = arith.constant 0 : i32
    %c0_i32_0 = arith.constant 0 : i32
    return %c0_i32, %arg0, %arg1 : i32, i32, i32
  }
  func.func @transform_3(%arg0: i32, %arg1: i32) -> (i32, i32, i32) {
    %c0_i32 = arith.constant 0 : i32
    %c0_i32_0 = arith.constant 0 : i32
    %c0_i32_1 = arith.constant 0 : i32
    %c0_i32_2 = arith.constant 0 : i32
    return %c0_i32, %c0_i32_0, %c0_i32_1 : i32, i32, i32
  }
  func.func @transform_4(%arg0: i32, %arg1: i32) -> (i32, i32) {
    %c0_i32 = arith.constant 0 : i32
    %c0_i32_0 = arith.constant 0 : i32
    return %arg0, %c0_i32 : i32, i32
  }
}

</mosaic_0001>

<bundles_post_ra>
// kernel: tpu_custom_call.1
= control target key start
LH: loop header
LB: loop body
LE: loop exit
PB: predicated region body
PF: predicated region fallthrough
CT: control target
= control target key end

     0   :  { %9 = vsyncpa [#allocation3], 0  ;;  %s3291_s0 = inlined_call_operand.hbm [shape: f32[256,128], index: 0, kind: input, shape index: {}]   ;;  %s3292_s1 = inlined_call_operand.vmem [shape: bf16[256,8], index: 1, kind: input, shape index: {}]   ;;  %s3293_s2 = inlined_call_operand.hbm [shape: bf16[3,256,256], index: 2, kind: input, shape index: {}]   ;;  %s3294_s3 = inlined_call_operand.vmem [shape: f32[3,8,128], index: 3, kind: input, shape index: {}]   ;;  %s3295_s4 = inlined_call_operand.hbm [shape: f32[256,128], index: 4, kind: output, shape index: {}]  }
   0x1   :  { %11 = vsyncpa [#allocation3 + $0x1], 0 }
   0x2   :  { %12 = vsyncpa [#allocation6], 0 }
   0x3   :  { %14 = vsyncpa [#allocation6 + $0x1], 0 }
   0x4   :  { %15 = vsyncpa [#allocation4], 0 }
   0x5   :  { %17 = vsyncpa [#allocation4 + $0x1], 0  ;;  %s2769_s15 = smov 0   ;;  %s2771_s16 = smov 0  }
   0x6   :  { %s2773_s17 = smov 0   ;;  %s2775_s18 = smov 0  }
   0x7   :  { %s2777_s19 = smov 0   ;;  %s2779_s20 = smov 0  }
   0x8 LB: > { %s1910_s21 = sadd.s32 4294967295, %s2730_s20   ;;  %s1911_s22 = sadd.s32 4294967294, %s2730_s20   ;;  %s2730_s20 = sphi %s2779_s20, %s23_s20   ;;  %s2726_s19 = sphi %s2777_s19, %s3309_s19   ;;  %s2722_s18 = sphi %s2775_s18, %s3308_s18   ;;  %s2718_s17 = sphi %s2773_s17, %s3307_s17   ;;  %s2714_s16 = sphi %s2771_s16, %s3306_s16   ;;  %s2710_s15 = sphi %s2769_s15, %s3305_s15  }
   0x9   : > { %s35_s23 = sadd.s32 1, %s2726_s19  ;;  %s42_s24 = sadd.s32 1, %s2718_s17 }
   0xa   : > { %p37_p0 = scmp.ge.s32.totalorder %s35_s23, 2  ;;  %p49_p1 = scmp.ne.s32.totalorder %s2718_s17, %s2714_s16 }
   0xb   : > { %p50_p2 = scmp.eq.s32.totalorder %s2730_s20, 0  ;;  %p55_p3 = scmp.ne.s32.totalorder %s2714_s16, %s2710_s15 }
   0xc   : > { %s3311_s23 = smov (%p37_p0, %s35_s23), 0  ;;  %p56_p5 = scmp.eq.s32.totalorder %s1910_s21, 0 }
   0xd   : > { %p2810_p4 = por %p50_p2, %p49_p1  ;;  %s39_s26 = ssub.s32 %s2726_s19, %s3311_s23 }
   0xe   : > { %p154_p6 = scmp.eq.s32.totalorder %s1910_s21, 1  ;;  %p40_p7 = scmp.eq.s32.totalorder %s39_s26, 0 }
   0xf   : > { %p2816_p8 = por %p56_p5, %p55_p3  ;;  %p160_p10 = scmp.eq.s32.totalorder %s1911_s22, 1 }
  0x10   : > { %p2820_p9 = por %p154_p6, %p49_p1  ;;  %p3296_p12 = scmp.ge.s32.totalorder %s2730_s20, 2 }
  0x11   : > { %s2825_s29 = scalar_select %p40_p7, %s2718_s17, %s42_s24  }
  0x12   : > { %s3300_s28 = scalar_select %p2820_p9, 1, 0 }
  0x13   : > { %p2827_p11 = por %p160_p10, %p55_p3  ;;  %188 = sbr.rel (%p3296_p12) target bundleno = 60 (0x3c), region = 24 }
  0x14   : > { %s2835_s5 = sand.u32 (!%p3296_p12), 1, %s2718_s17   ;;  %s2077_s6 = sshll.u32 (!%p3296_p12), %s2726_s19, 11 }
  0x15   : > { %s3301_s30 = scalar_select %p2827_p11, 1, 0 }
  0x16   : > { %s1915_s7 = sshll.u32 (!%p3296_p12), %s2835_s5, 7  ;;  %s2844_s10 = scalar_lea.hbm (!%p3296_p12), %s3291_s0, %s2077_s6 }
  0x17   : > { %s196_s11 = scalar_lea.vmem (!%p3296_p12), [#allocation2], %s1915_s7  ;;  %s193_s13 = scalar_lea.sflag (!%p3296_p12), [#allocation3], %s2835_s5 }
  0x18   : > { %s203_s12 = sshll.u32 (!%p3296_p12), %s196_s11, 4  ;;  %s2616_s14 = scalar_lea.hbm (!%p3296_p12), %s2844_s10, 2048  ;;  %s2846_s12 = int_to_ptr.vmem [resolvable:$true] %s203_s12 }
  0x19   : > { %p2617_p13 = scmp.ne.s32.totalorder (!%p3296_p12), %s2844_s10, %s2616_s14  ;;  %s2620_s24 = scalar_lea.hbm (!%p3296_p12), %s3291_s0, 4096 }
  0x1a   : > { %p2621_p2 = scmp.lt.u32.totalorder %s2844_s10, %s3291_s0  ;;  %p2622_p3 = scmp.lt.u32.totalorder %s2620_s24, %s2616_s14 }
  0x1b   : > { %p2618_p0 = pnand %p2617_p13, %p2810_p4  ;;  %p2624_p6 = scmp.lt.u32.totalorder %s2616_s14, %s2844_s10 }
  0x1c   : > { %p2623_p5 = por %p2622_p3, %p2621_p2 }
  0x1d   : > { %p2619_p1 = pneg %p2618_p0 }
  0x1e   : > { %p2625_p7 = por %p2624_p6, %p2623_p5 }
  0x20   : > { %p2626_p10 = pnand %p2625_p7, %p2619_p1 }
  0x22   : > { %2629 = shalt.err (!%p2626_p10)
}
  0x23   : > { %s2630_s7 = scalar_lea.vmem %s2846_s12, 2048  ;;  %s2732_s9 = smov [#allocation2]  }
  0x24   : > { %p2631_p13 = scmp.ne.s32.totalorder %s2846_s12, %s2630_s7  ;;  %s2634_s11 = sshll.u32 %s2732_s9, 4  ;;  %s2635_s11 = int_to_ptr.vmem [resolvable:$false] %s2634_s11 }
  0x25   : > { %s2636_s21 = scalar_lea.vmem %s2635_s11, 4096  ;;  %p2637_p11 = scmp.lt.s32.totalorder %s2846_s12, %s2635_s11 }
  0x26   : > { %p2632_p0 = pnand %p2631_p13, %p2810_p4  ;;  %p2638_p9 = scmp.lt.s32.totalorder %s2636_s21, %s2630_s7 }
  0x28   : > { %p2633_p12 = pneg %p2632_p0  ;;  %p2639_p2 = por %p2638_p9, %p2637_p11 }
  0x2a   : > { %p2640_p3 = pnand %p2639_p2, %p2633_p12 }
  0x2c   : > { %2643 = shalt.err (!%p2640_p3)
}
  0x2d   : > { %s2733_s14 = smov 128   ;;  %s2734_s22 = smov 8  }
  0x2e   : > { %2452 = dma.hbm_to_vmem [thread:$0]  (%p2810_p4), %s2844_s10, 2048, %s2846_s12, %s193_s13, %s2733_s14, %s2733_s14, %s2734_s22  }
  0x2f   : > { %s2450_s24 = smul.u32 384, %s2835_s5  ;;  %s2735_s26 = smov 4096  }
  0x30   : > { %2454 = sst [smem:[#allocation9]] (%p2810_p4), %s2735_s26  ;;  %s226_s10 = scalar_lea.hbm %s3293_s2, %s2077_s6 }
  0x31   : > { %s2453_s8 = scalar_select %p2810_p4, [#allocation0], [#allocation10] }
  0x32   : > { %s217_s13 = scalar_lea.vmem [#allocation5], %s2450_s24  ;;  %s2736_s21 = smov 2048  }
  0x33   : > { %s231_s12 = sld [smem:[%s2453_s8]]   ;;  %s239_s11 = sshll.u32 %s217_s13, 4  ;;  %s240_s11 = int_to_ptr.vmem [resolvable:$true] %s239_s11 }
  0x34   : > { %2455 = sst [smem:[#allocation9 + $0x1]] (%p2810_p4), %s2736_s21  ;;  %s2737_s14 = smov 16  }
  0x35   : > { %2456 = sst [smem:[#allocation9 + $0x2]] (%p2810_p4), %s2737_s14  ;;  %s2738_s22 = smov 128  }
  0x36   : > { %2457 = sst [smem:[#allocation9 + $0x3]] (%p2810_p4), %s2738_s22  ;;  %s2739_s26 = smov 8  }
  0x37   : > { %2458 = sst [smem:[#allocation9 + $0x4]] (%p2810_p4), %s2738_s22  ;;  %s214_s24 = scalar_lea.sflag [#allocation6], %s2835_s5 }
  0x38   : > { %2459 = sst [smem:[#allocation9 + $0x5]] (%p2810_p4), %s2739_s26  ;;  %s2740_s7 = smov [#allocation8]  }
  0x39   : > { %s1921_s6 = sshll.u32 %s231_s12, 26 }
  0x3a   : > { %s1922_s8 = sadd.s32 134217728, %s1921_s6 }
  0x3b   : > { %2460 = dma.general (%p2810_p4), %s226_s10, 6144, %s240_s11, %s214_s24, %s2740_s7, [#allocation9], %s1922_s8, 0  }
  0x3c PF: > { %p1923_p9 = scmp.ge.s32.totalorder %s2730_s20, 1  ;;  %p260_p11 = scmp.lt.s32.totalorder %s2730_s20, 3 }
  0x3e   : > { %p261_p12 = pnand %p1923_p9, %p260_p11 }
  0x3f   : > { %s2898_s9 = sand.u32 (!%p261_p12), 1, %s2714_s16  }
  0x40   : > { %264 = sbr.rel (%p261_p12) target bundleno = 923 (0x39b), region = 36  ;;  %s1924_s12 = sshll.u32 (!%p261_p12), %s2898_s9, 7 }
  0x41   : > { %s267_s13 = scalar_lea.sflag (!%p261_p12), [#allocation3], %s2898_s9  ;;  %s2904_s5 = scalar_lea.vmem (!%p261_p12), [#allocation2], %s1924_s12 }
  0x47   : > { %2697 = dma.done.wait (%p2816_p8), %s267_s13, 2048  }
  0x48   : > { %2699 = vsyncadd (%p2816_p8), %s267_s13, 4294965248  ;;  %s2451_s25 = smul.u32 384, %s2898_s9  ;;  %s276_s10 = scalar_lea.sflag [#allocation6], %s2898_s9 }
  0x4a   : > { %s2912_s11 = scalar_lea.vmem [#allocation5], %s2451_s25 }
  0x4b   : > { %2701 = dma.done.wait (%p2816_p8), %s276_s10, 6144  }
  0x4c   : > { %2703 = vsyncadd (%p2816_p8), %s276_s10, 4294961152  ;;  %v2921_v0 = vld [vmem:[%s3292_s1 + $0x40] sm:$0xff]   ;;  %v2932_v2 = vld [vmem:[%s3292_s1 + $0x48] sm:$0xff]   ;;  %vm699_vm0 = vcmask 64512   ;;  %p3302_p8 = scmp.ne.s32.totalorder %s3300_s28, 0  ;;  %s2741_s27 = smov [#allocation7]  }
  0x4d   : > { %v2926_v1 = vld [vmem:[%s3292_s1] sm:$0xff]   ;;  %2081 = vmatprep.subr.bf16.mxu0 %v2921_v0  ;;  %v2938_v3 = vld [vmem:[%s3292_s1 + $0x8] sm:$0xff]   ;;  %v2944_v4 = vld [vmem:[%s3292_s1 + $0x50] sm:$0xff]   ;;  %s2648_s24 = sshll.u32 %s2741_s27, 4  ;;  %s2649_s24 = int_to_ptr.vmem [resolvable:$false] %s2648_s24 }
  0x4e   : > { %2082 = vmatpush3.bf16.msra.mxu0 %v2926_v1  ;;  %v2950_v5 = vld [vmem:[%s3292_s1 + $0x10] sm:$0xff]   ;;  %v2956_v6 = vld [vmem:[%s3292_s1 + $0x58] sm:$0xff]   ;;  %v2968_v8 = vld [vmem:[%s3292_s1 + $0x60] sm:$0xff]   ;;  %s2650_s7 = scalar_lea.vmem %s2649_s24, 4096 }
  0x4f   : > { %2083 = vmatprep.subr.bf16.mxu0 %v2932_v2  ;;  %v2962_v7 = vld [vmem:[%s3292_s1 + $0x18] sm:$0xff]   ;;  %v2974_v9 = vld [vmem:[%s3292_s1 + $0x20] sm:$0xff]   ;;  %v2980_v10 = vld [vmem:[%s3292_s1 + $0x68] sm:$0xff]  }
  0x50   : > { %v2546_v11 = vld [vmem:[%s2912_s11 + $0x4] ss:$8 sps:$4 sm:$0xff]   ;;  %v2993_v13 = vld [vmem:[%s3292_s1 + $0x70] sm:$0xff]   ;;  %v3005_v15 = vld [vmem:[%s3292_s1 + $0x78] sm:$0xff]  }
  0x51   : > { %v2987_v12 = vld [vmem:[%s3292_s1 + $0x28] sm:$0xff]   ;;  %633 = vmatprep.mubr.bf16.mxu0 %v2546_v11  ;;  %v2999_v14 = vld [vmem:[%s3292_s1 + $0x30] sm:$0xff]   ;;  %v3010_v16 = vld [vmem:[%s3292_s1 + $0x38] sm:$0xff]  }
  0x52   : > { %2084 = vmatpush3.bf16.msra.mxu0 %v2938_v3  ;;  %v2544_v17 = vld [vmem:[%s2912_s11] ss:$8 sps:$4 sm:$0xff]   ;;  %v2547_v18 = vld [vmem:[%s2912_s11 + $0x14] ss:$8 sps:$4 sm:$0xff]   ;;  %v2549_v19 = vld [vmem:[%s2912_s11 + $0x10] ss:$8 sps:$4 sm:$0xff]  }
  0x53   : > { %2085 = vmatprep.subr.bf16.mxu0 %v2944_v4  ;;  %v2550_v20 = vld [vmem:[%s2912_s11 + $0x24] ss:$8 sps:$4 sm:$0xff]   ;;  %v2552_v21 = vld [vmem:[%s2912_s11 + $0x20] ss:$8 sps:$4 sm:$0xff]   ;;  %v2553_v22 = vld [vmem:[%s2912_s11 + $0x34] ss:$8 sps:$4 sm:$0xff]  }
  0x54   : > { %v2555_v23 = vld [vmem:[%s2912_s11 + $0x30] ss:$8 sps:$4 sm:$0xff]   ;;  %v2556_v24 = vld [vmem:[%s2912_s11 + $0x44] ss:$8 sps:$4 sm:$0xff]   ;;  %v2558_v25 = vld [vmem:[%s2912_s11 + $0x40] ss:$8 sps:$4 sm:$0xff]  }
  0x55   : > { %v2559_v26 = vld [vmem:[%s2912_s11 + $0x54] ss:$8 sps:$4 sm:$0xff]   ;;  %v2561_v27 = vld [vmem:[%s2912_s11 + $0x50] ss:$8 sps:$4 sm:$0xff]   ;;  %v2562_v28 = vld [vmem:[%s2912_s11 + $0x64] ss:$8 sps:$4 sm:$0xff]  }
  0x56   : > { %2086 = vmatpush3.bf16.msra.mxu0 %v2950_v5  ;;  %v2564_v29 = vld [vmem:[%s2912_s11 + $0x60] ss:$8 sps:$4 sm:$0xff]   ;;  %v2565_v30 = vld [vmem:[%s2912_s11 + $0x74] ss:$8 sps:$4 sm:$0xff]   ;;  %v2567_v31 = vld [vmem:[%s2912_s11 + $0x70] ss:$8 sps:$4 sm:$0xff]  }
  0x57   : > { %2087 = vmatprep.subr.bf16.mxu0 %v2956_v6  ;;  %v698_v32 = vld [vmem:[%s3294_s3] sm:$0xff]  ;;  %v2586_v35 = vld [vmem:[%s2912_s11 + $0x114] ss:$8 sps:$4 sm:$0xff]   ;;  %v2588_v36 = vld [vmem:[%s2912_s11 + $0x110] ss:$8 sps:$4 sm:$0xff]  }
  0x58   : > { %2324 = vmatprep.subr.mxu1 %v698_v32  ;;  %v2580_v33 = vld [vmem:[%s2912_s11 + $0x100] ss:$8 sps:$4 sm:$0xff]   ;;  %v2582_v34 = vld [vmem:[%s2912_s11 + $0x104] ss:$8 sps:$4 sm:$0xff]   ;;  %v2598_v39 = vld [vmem:[%s2912_s11 + $0x134] ss:$8 sps:$4 sm:$0xff]  }
  0x59   : > { %2325 = vmatpush3.msra.mxu1 %v698_v32  ;;  %v2592_v37 = vld [vmem:[%s2912_s11 + $0x124] ss:$8 sps:$4 sm:$0xff]   ;;  %v2594_v38 = vld [vmem:[%s2912_s11 + $0x120] ss:$8 sps:$4 sm:$0xff]   ;;  %v2600_v40 = vld [vmem:[%s2912_s11 + $0x130] ss:$8 sps:$4 sm:$0xff]  }
  0x5a   : > { %2088 = vmatpush3.bf16.msra.mxu0 %v2962_v7  ;;  %2162 = vmatprep.subr.bf16.mxu1 %v2921_v0  ;;  %v2604_v41 = vld [vmem:[%s2912_s11 + $0x144] ss:$8 sps:$4 sm:$0xff]   ;;  %v2606_v42 = vld [vmem:[%s2912_s11 + $0x140] ss:$8 sps:$4 sm:$0xff]   ;;  %v2607_v43 = vld [vmem:[%s2912_s11 + $0x154] ss:$8 sps:$4 sm:$0xff]  }
  0x5b   : > { %2089 = vmatprep.subr.bf16.mxu0 %v2968_v8  ;;  %v2609_v46 = vld [vmem:[%s2912_s11 + $0x150] ss:$8 sps:$4 sm:$0xff]   ;;  %v2610_v49 = vld [vmem:[%s2912_s11 + $0x164] ss:$8 sps:$4 sm:$0xff]   ;;  %v2612_v54 = vld [vmem:[%s2912_s11 + $0x160] ss:$8 sps:$4 sm:$0xff]  }
  0x5c   : > { %v2613_v57 = vld [vmem:[%s2912_s11 + $0x174] ss:$8 sps:$4 sm:$0xff]   ;;  %v2615_v62 = vld [vmem:[%s2912_s11 + $0x170] ss:$8 sps:$4 sm:$0xff]  }
  0x5e   : > { %2090 = vmatpush3.bf16.msra.mxu0 %v2974_v9 }
  0x5f   : > { %2091 = vmatprep.subr.bf16.mxu0 %v2980_v10 }
  0x62   : > { %2092 = vmatpush3.bf16.msra.mxu0 %v2987_v12 }
  0x63   : > { %2093 = vmatprep.subr.bf16.mxu0 %v2993_v13 }
  0x66   : > { %2094 = vmatpush3.bf16.msra.mxu0 %v2999_v14 }
  0x67   : > { %2095 = vmatprep.subr.bf16.mxu0 %v3005_v15 }
  0x6a   : > { %2096 = vmatpush3.bf16.msra.mxu0 %v3010_v16 }
  0x6b   : > { %2243 = vmatprep.subr.bf16.mxu0 %v2921_v0 }
  0x6d   : > { %634 = vmatmul.mubr.bf16.vlgmr.msra.gmra.mrb[0].mxu0 %v2544_v17 }
  0x6e   : > { %641 = vmatprep.mubr.bf16.mxu0 %v2547_v18  ;;  %2244 = vmatpush3.bf16.msra.mxu0 %v2926_v1 }
  0x6f   : > { %2245 = vmatprep.subr.bf16.mxu0 %v2932_v2 }
  0x72   : > { %2246 = vmatpush3.bf16.msra.mxu0 %v2938_v3 }
  0x73   : > { %2247 = vmatprep.subr.bf16.mxu0 %v2944_v4 }
  0x75   : > { %642 = vmatmul.mubr.bf16.gmra.mrb[4].mxu0 %v2549_v19 }
  0x76   : > { %649 = vmatprep.mubr.bf16.mxu0 %v2550_v20  ;;  %2248 = vmatpush3.bf16.msra.mxu0 %v2950_v5 }
  0x77   : > { %2249 = vmatprep.subr.bf16.mxu0 %v2956_v6 }
  0x7a   : > { %2250 = vmatpush3.bf16.msra.mxu0 %v2962_v7 }
  0x7b   : > { %2251 = vmatprep.subr.bf16.mxu0 %v2968_v8 }
  0x7d   : > { %650 = vmatmul.mubr.bf16.gmra.mrb[8].mxu0 %v2552_v21 }
  0x7e   : > { %657 = vmatprep.mubr.bf16.mxu0 %v2553_v22  ;;  %2252 = vmatpush3.bf16.msra.mxu0 %v2974_v9 }
  0x7f   : > { %2253 = vmatprep.subr.bf16.mxu0 %v2980_v10 }
  0x82   : > { %2254 = vmatpush3.bf16.msra.mxu0 %v2987_v12 }
  0x83   : > { %2255 = vmatprep.subr.bf16.mxu0 %v2993_v13 }
  0x85   : > { %658 = vmatmul.mubr.bf16.gmra.mrb[12].mxu0 %v2555_v23 }
  0x86   : > { %665 = vmatprep.mubr.bf16.mxu0 %v2556_v24  ;;  %2256 = vmatpush3.bf16.msra.mxu0 %v2999_v14 }
  0x87   : > { %2257 = vmatprep.subr.bf16.mxu0 %v3005_v15 }
  0x8a   : > { %2258 = vmatpush3.bf16.msra.mxu0 %v3010_v16 }
  0x8d   : > { %666 = vmatmul.mubr.bf16.gmra.mrb[16].mxu0 %v2558_v25 }
  0x8e   : > { %673 = vmatprep.mubr.bf16.mxu0 %v2559_v26 }
  0x95   : > { %674 = vmatmul.mubr.bf16.gmra.mrb[20].mxu0 %v2561_v27 }
  0x96   : > { %681 = vmatprep.mubr.bf16.mxu0 %v2562_v28 }
  0x9d   : > { %682 = vmatmul.mubr.bf16.gmra.mrb[24].mxu0 %v2564_v29 }
  0x9e   : > { %689 = vmatprep.mubr.bf16.mxu0 %v2565_v30 }
  0xa5   : > { %690 = vmatmul.mubr.bf16.gmra.mrb[28].mxu0 %v2567_v31 }
  0xa6   : > { %1443 = vmatprep.mubr.bf16.mxu0 %v2582_v34 }
  0xad   : > { %1444 = vmatmul.mubr.bf16.vlgmr.msra.gmra.mrb[32].mxu0 %v2580_v33  ;;  %v2570_v33 = vld [vmem:[%s2912_s11 + $0x84] ss:$8 sps:$4 sm:$0xff]  }
  0xae   : > { %1451 = vmatprep.mubr.bf16.mxu0 %v2586_v35  ;;  %v2568_v35 = vld [vmem:[%s2912_s11 + $0x80] ss:$8 sps:$4 sm:$0xff]  }
  0xb5   : > { %1452 = vmatmul.mubr.bf16.gmra.mrb[36].mxu0 %v2588_v36  ;;  %v2571_v36 = vld [vmem:[%s2912_s11 + $0x94] ss:$8 sps:$4 sm:$0xff]  }
  0xb6   : > { %1459 = vmatprep.mubr.bf16.mxu0 %v2592_v37  ;;  %v2573_v37 = vld [vmem:[%s2912_s11 + $0x90] ss:$8 sps:$4 sm:$0xff]  }
  0xbd   : > { %1460 = vmatmul.mubr.bf16.gmra.mrb[40].mxu0 %v2594_v38  ;;  %v2574_v38 = vld [vmem:[%s2912_s11 + $0xa4] ss:$8 sps:$4 sm:$0xff]  }
  0xbe   : > { %1467 = vmatprep.mubr.bf16.mxu0 %v2598_v39  ;;  %v2576_v39 = vld [vmem:[%s2912_s11 + $0xa0] ss:$8 sps:$4 sm:$0xff]  }
  0xc5   : > { %1468 = vmatmul.mubr.bf16.gmra.mrb[44].mxu0 %v2600_v40  ;;  %v2577_v40 = vld [vmem:[%s2912_s11 + $0xb4] ss:$8 sps:$4 sm:$0xff]  }
  0xc6   : > { %1475 = vmatprep.mubr.bf16.mxu0 %v2604_v41  ;;  %v2579_v41 = vld [vmem:[%s2912_s11 + $0xb0] ss:$8 sps:$4 sm:$0xff]  }
  0xcd   : > { %1476 = vmatmul.mubr.bf16.gmra.mrb[48].mxu0 %v2606_v42  ;;  %v2583_v42 = vld [vmem:[%s2912_s11 + $0xc4] ss:$8 sps:$4 sm:$0xff]  }
  0xce   : > { %1483 = vmatprep.mubr.bf16.mxu0 %v2607_v43  ;;  %v2585_v43 = vld [vmem:[%s2912_s11 + $0xc0] ss:$8 sps:$4 sm:$0xff]  }
  0xd5   : > { %1484 = vmatmul.mubr.bf16.gmra.mrb[52].mxu0 %v2609_v46  ;;  %v2595_v46 = vld [vmem:[%s2912_s11 + $0xe4] ss:$8 sps:$4 sm:$0xff]  }
  0xd6   : > { %1491 = vmatprep.mubr.bf16.mxu0 %v2610_v49  ;;  %v2603_v49 = vld [vmem:[%s2912_s11 + $0xf0] ss:$8 sps:$4 sm:$0xff]  }
  0xdd   : > { %1492 = vmatmul.mubr.bf16.gmra.mrb[56].mxu0 %v2612_v54 }
  0xde   : > { %1499 = vmatprep.mubr.bf16.mxu0 %v2613_v57 }
  0xe5   : > { %1500 = vmatmul.mubr.bf16.gmra.mrb[60].mxu0 %v2615_v62 }
 0x140   : > { %v2097_v44 = vpop.f32.mrb[0].mxu0 }
 0x141   : > { %v2098_v45 = vpop.f32.mrb[1].mxu0 }
 0x142   : > { %v2099_v47 = vadd.f32 %v2098_v45, %v2097_v44  ;;  %v2100_v48 = vpop.f32.mrb[2].mxu0  ;;  %v2589_v44 = vld [vmem:[%s2912_s11 + $0xd4] ss:$8 sps:$4 sm:$0xff]   ;;  %v2591_v45 = vld [vmem:[%s2912_s11 + $0xd0] ss:$8 sps:$4 sm:$0xff]  }
 0x143   : > { %v2101_v50 = vpop.f32.mrb[3].mxu0 }
 0x144   : > { %v2102_v51 = vadd.f32 %v2101_v50, %v2100_v48  ;;  %2326 = vmatprep.mubr.msk.f32.mxu1 %vm699_vm0, %v2099_v47  ;;  %v2597_v47 = vld [vmem:[%s2912_s11 + $0xe0] ss:$8 sps:$4 sm:$0xff]   ;;  %v2601_v48 = vld [vmem:[%s2912_s11 + $0xf4] ss:$8 sps:$4 sm:$0xff]   ;;  %s3205_s11 = scalar_lea.vmem [#allocation7], %s1924_s12  ;;  %s2080_s12 = sshll.u32 %s2722_s18, 11 }
 0x145   : > { %s1788_s22 = sshll.u32 %s3205_s11, 4  ;;  %s3238_s8 = scalar_lea.hbm %s3295_s4, %s2080_s12  ;;  %s3240_s22 = int_to_ptr.vmem [resolvable:$true] %s1788_s22 }
 0x146   : > { %2327 = vmatmul.mubr.msk.f32.vlgmr.msra.gmra.mrb[0].mxu1 %vm699_vm0, %v2102_v51  ;;  %s1775_s18 = scalar_lea.sflag [#allocation4], %s2898_s9  ;;  %p2651_p6 = scmp.lt.s32.totalorder %s3240_s22, %s2649_s24 }
 0x147   : > { %2163 = vmatpush3.bf16.msra.mxu1 %v2926_v1 }
 0x148   : > { %v2103_v52 = vpop.f32.mrb[4].mxu0  ;;  %2164 = vmatprep.subr.bf16.mxu1 %v2932_v2 }
 0x149   : > { %v2104_v53 = vpop.f32.mrb[5].mxu0 }
 0x14a   : > { %v2105_v55 = vadd.f32 %v2104_v53, %v2103_v52  ;;  %v2106_v56 = vpop.f32.mrb[6].mxu0 }
 0x14b   : > { %v2107_v58 = vpop.f32.mrb[7].mxu0  ;;  %2165 = vmatpush3.bf16.msra.mxu1 %v2938_v3 }
 0x14c   : > { %v2108_v59 = vadd.f32 %v2107_v58, %v2106_v56  ;;  %2329 = vmatprep.mubr.msk.f32.mxu1 %vm699_vm0, %v2105_v55  ;;  %2166 = vmatprep.subr.bf16.mxu1 %v2944_v4  ;;  %v2055_v56 = vld [vmem:[%s3294_s3 + $0x10] sm:$0xff] }
 0x14e   : > { %2330 = vmatmul.mubr.msk.f32.gmra.mrb[2].mxu1 %vm699_vm0, %v2108_v59 }
 0x14f   : > { %2167 = vmatpush3.bf16.msra.mxu1 %v2950_v5 }
 0x150   : > { %v2109_v60 = vpop.f32.mrb[8].mxu0  ;;  %2168 = vmatprep.subr.bf16.mxu1 %v2956_v6 }
 0x151   : > { %v2110_v61 = vpop.f32.mrb[9].mxu0 }
 0x152   : > { %v2111_v63 = vadd.f32 %v2110_v61, %v2109_v60  ;;  %v2112_v0 = vpop.f32.mrb[10].mxu0 }
 0x153   : > { %v2113_v1 = vpop.f32.mrb[11].mxu0  ;;  %2169 = vmatpush3.bf16.msra.mxu1 %v2962_v7 }
 0x154   : > { %v2114_v2 = vadd.f32 %v2113_v1, %v2112_v0  ;;  %2332 = vmatprep.mubr.msk.f32.mxu1 %vm699_vm0, %v2111_v63  ;;  %2170 = vmatprep.subr.bf16.mxu1 %v2968_v8 }
 0x156   : > { %2333 = vmatmul.mubr.msk.f32.gmra.mrb[4].mxu1 %vm699_vm0, %v2114_v2 }
 0x157   : > { %2171 = vmatpush3.bf16.msra.mxu1 %v2974_v9 }
 0x158   : > { %v2115_v3 = vpop.f32.mrb[12].mxu0  ;;  %2172 = vmatprep.subr.bf16.mxu1 %v2980_v10  ;;  %v2006_v10 = vld [vmem:[%s3294_s3 + $0x8] sm:$0xff] }
 0x159   : > { %v2116_v4 = vpop.f32.mrb[13].mxu0 }
 0x15a   : > { %v2117_v5 = vadd.f32 %v2116_v4, %v2115_v3  ;;  %v2118_v6 = vpop.f32.mrb[14].mxu0 }
 0x15b   : > { %v2119_v11 = vpop.f32.mrb[15].mxu0  ;;  %2173 = vmatpush3.bf16.msra.mxu1 %v2987_v12 }
 0x15c   : > { %v2120_v7 = vadd.f32 %v2119_v11, %v2118_v6  ;;  %2335 = vmatprep.mubr.msk.f32.mxu1 %vm699_vm0, %v2117_v5  ;;  %2174 = vmatprep.subr.bf16.mxu1 %v2993_v13 }
 0x15e   : > { %2336 = vmatmul.mubr.msk.f32.gmra.mrb[6].mxu1 %vm699_vm0, %v2120_v7 }
 0x15f   : > { %2175 = vmatpush3.bf16.msra.mxu1 %v2999_v14 }
 0x160   : > { %v2121_v8 = vpop.f32.mrb[16].mxu0  ;;  %2176 = vmatprep.subr.bf16.mxu1 %v3005_v15 }
 0x161   : > { %v2122_v9 = vpop.f32.mrb[17].mxu0 }
 0x162   : > { %v2123_v17 = vadd.f32 %v2122_v9, %v2121_v8  ;;  %v2124_v18 = vpop.f32.mrb[18].mxu0 }
 0x163   : > { %v2125_v12 = vpop.f32.mrb[19].mxu0  ;;  %2177 = vmatpush3.bf16.msra.mxu1 %v3010_v16 }
 0x164   : > { %v2126_v19 = vadd.f32 %v2125_v12, %v2124_v18  ;;  %2338 = vmatprep.mubr.msk.f32.mxu1 %vm699_vm0, %v2123_v17  ;;  %2350 = vmatprep.subr.mxu1 %v2006_v10 }
 0x166   : > { %2339 = vmatmul.mubr.msk.f32.gmra.mrb[8].mxu1 %vm699_vm0, %v2126_v19 }
 0x168   : > { %v2127_v13 = vpop.f32.mrb[20].mxu0 }
 0x169   : > { %v2128_v14 = vpop.f32.mrb[21].mxu0 }
 0x16a   : > { %v2129_v20 = vadd.f32 %v2128_v14, %v2127_v13  ;;  %v2130_v15 = vpop.f32.mrb[22].mxu0 }
 0x16b   : > { %v2131_v21 = vpop.f32.mrb[23].mxu0 }
 0x16c   : > { %v2132_v22 = vadd.f32 %v2131_v21, %v2130_v15  ;;  %2341 = vmatprep.mubr.msk.f32.mxu1 %vm699_vm0, %v2129_v20 }
 0x16e   : > { %2342 = vmatmul.mubr.msk.f32.gmra.mrb[10].mxu1 %vm699_vm0, %v2132_v22 }
 0x170   : > { %v2133_v23 = vpop.f32.mrb[24].mxu0 }
 0x171   : > { %v2134_v24 = vpop.f32.mrb[25].mxu0 }
 0x172   : > { %v2135_v16 = vadd.f32 %v2134_v24, %v2133_v23  ;;  %v2136_v25 = vpop.f32.mrb[26].mxu0 }
 0x173   : > { %v2137_v26 = vpop.f32.mrb[27].mxu0 }
 0x174   : > { %v2138_v27 = vadd.f32 %v2137_v26, %v2136_v25  ;;  %2344 = vmatprep.mubr.msk.f32.mxu1 %vm699_vm0, %v2135_v16 }
 0x176   : > { %2345 = vmatmul.mubr.msk.f32.gmra.mrb[12].mxu1 %vm699_vm0, %v2138_v27 }
 0x178   : > { %v2139_v28 = vpop.f32.mrb[28].mxu0 }
 0x179   : > { %v2140_v29 = vpop.f32.mrb[29].mxu0 }
 0x17a   : > { %v2141_v30 = vadd.f32 %v2140_v29, %v2139_v28  ;;  %v2142_v31 = vpop.f32.mrb[30].mxu0 }
 0x17b   : > { %v2143_v32 = vpop.f32.mrb[31].mxu0 }
 0x17c   : > { %v2144_v34 = vadd.f32 %v2143_v32, %v2142_v31  ;;  %2347 = vmatprep.mubr.msk.f32.mxu1 %vm699_vm0, %v2141_v30 }
 0x17e   : > { %2348 = vmatmul.mubr.msk.f32.gmra.mrb[14].mxu1 %vm699_vm0, %v2144_v34 }
 0x17f   : > { %1038 = vmatprep.mubr.bf16.mxu1 %v2570_v33 }
 0x180   : > { %v2259_v50 = vpop.f32.mrb[32].mxu0 }
 0x181   : > { %v2260_v51 = vpop.f32.mrb[33].mxu0 }
 0x182   : > { %1039 = vmatmul.mubr.bf16.vlgmr.msra.gmra.mrb[16].mxu1 %v2568_v35  ;;  %v3116_v52 = vadd.f32 %v2260_v51, %v2259_v50  ;;  %v2262_v53 = vpop.f32.mrb[34].mxu0 }
 0x183   : > { %1046 = vmatprep.mubr.bf16.mxu1 %v2571_v36  ;;  %2351 = vmatpush3.msra.mxu1 %v2006_v10  ;;  %v2263_v54 = vpop.f32.mrb[35].mxu0 }
 0x184   : > { %v3118_v55 = vadd.f32 %v2263_v54, %v2262_v53  ;;  %2376 = vmatprep.subr.mxu1 %v2055_v56 }
 0x188   : > { %v2265_v57 = vpop.f32.mrb[36].mxu0 }
 0x189   : > { %v2266_v58 = vpop.f32.mrb[37].mxu0 }
 0x18a   : > { %1047 = vmatmul.mubr.bf16.gmra.mrb[20].mxu1 %v2573_v37  ;;  %v3123_v59 = vadd.f32 %v2266_v58, %v2265_v57  ;;  %v2268_v60 = vpop.f32.mrb[38].mxu0 }
 0x18b   : > { %1054 = vmatprep.mubr.bf16.mxu1 %v2574_v38  ;;  %v2269_v61 = vpop.f32.mrb[39].mxu0 }
 0x18c   : > { %v3125_v62 = vadd.f32 %v2269_v61, %v2268_v60 }
 0x190   : > { %v2271_v63 = vpop.f32.mrb[40].mxu0 }
 0x191   : > { %v2272_v0 = vpop.f32.mrb[41].mxu0 }
 0x192   : > { %1055 = vmatmul.mubr.bf16.gmra.mrb[24].mxu1 %v2576_v39  ;;  %v3127_v1 = vadd.f32 %v2272_v0, %v2271_v63  ;;  %v2274_v2 = vpop.f32.mrb[42].mxu0 }
 0x193   : > { %1062 = vmatprep.mubr.bf16.mxu1 %v2577_v40  ;;  %v2275_v3 = vpop.f32.mrb[43].mxu0 }
 0x194   : > { %v3129_v4 = vadd.f32 %v2275_v3, %v2274_v2 }
 0x198   : > { %v2277_v5 = vpop.f32.mrb[44].mxu0 }
 0x199   : > { %v2278_v6 = vpop.f32.mrb[45].mxu0 }
 0x19a   : > { %1063 = vmatmul.mubr.bf16.gmra.mrb[28].mxu1 %v2579_v41  ;;  %v3131_v11 = vadd.f32 %v2278_v6, %v2277_v5  ;;  %v2280_v7 = vpop.f32.mrb[46].mxu0 }
 0x19b   : > { %1070 = vmatprep.mubr.bf16.mxu1 %v2583_v42  ;;  %v2281_v8 = vpop.f32.mrb[47].mxu0 }
 0x19c   : > { %v3133_v9 = vadd.f32 %v2281_v8, %v2280_v7 }
 0x1a0   : > { %v2283_v10 = vpop.f32.mrb[48].mxu0 }
 0x1a1   : > { %v2284_v17 = vpop.f32.mrb[49].mxu0 }
 0x1a2   : > { %1071 = vmatmul.mubr.bf16.gmra.mrb[32].mxu1 %v2585_v43  ;;  %v3135_v18 = vadd.f32 %v2284_v17, %v2283_v10  ;;  %v2286_v12 = vpop.f32.mrb[50].mxu0 }
 0x1a3   : > { %1078 = vmatprep.mubr.bf16.mxu1 %v2589_v44  ;;  %v2287_v19 = vpop.f32.mrb[51].mxu0 }
 0x1a4   : > { %v3137_v13 = vadd.f32 %v2287_v19, %v2286_v12 }
 0x1a8   : > { %v2289_v14 = vpop.f32.mrb[52].mxu0 }
 0x1a9   : > { %v2290_v20 = vpop.f32.mrb[53].mxu0 }
 0x1aa   : > { %1079 = vmatmul.mubr.bf16.gmra.mrb[36].mxu1 %v2591_v45  ;;  %v3139_v15 = vadd.f32 %v2290_v20, %v2289_v14  ;;  %v2292_v21 = vpop.f32.mrb[54].mxu0 }
 0x1ab   : > { %1086 = vmatprep.mubr.bf16.mxu1 %v2595_v46  ;;  %v2293_v22 = vpop.f32.mrb[55].mxu0 }
 0x1ac   : > { %v3141_v23 = vadd.f32 %v2293_v22, %v2292_v21 }
 0x1b0   : > { %v2295_v24 = vpop.f32.mrb[56].mxu0 }
 0x1b1   : > { %v2296_v16 = vpop.f32.mrb[57].mxu0 }
 0x1b2   : > { %1087 = vmatmul.mubr.bf16.gmra.mrb[40].mxu1 %v2597_v47  ;;  %v3143_v25 = vadd.f32 %v2296_v16, %v2295_v24  ;;  %v2298_v26 = vpop.f32.mrb[58].mxu0 }
 0x1b3   : > { %1094 = vmatprep.mubr.bf16.mxu1 %v2601_v48  ;;  %v2299_v27 = vpop.f32.mrb[59].mxu0 }
 0x1b4   : > { %v3145_v28 = vadd.f32 %v2299_v27, %v2298_v26 }
 0x1b8   : > { %v2301_v29 = vpop.f32.mrb[60].mxu0 }
 0x1b9   : > { %v2302_v30 = vpop.f32.mrb[61].mxu0 }
 0x1ba   : > { %1095 = vmatmul.mubr.bf16.gmra.mrb[44].mxu1 %v2603_v49  ;;  %v3147_v31 = vadd.f32 %v2302_v30, %v2301_v29  ;;  %v2304_v32 = vpop.f32.mrb[62].mxu0 }
 0x1bb   : > { %v2305_v33 = vpop.f32.mrb[63].mxu0 }
 0x1bc   : > { %v3149_v34 = vadd.f32 %v2305_v33, %v2304_v32 }
 0x255   : > { %v2178_v35 = vpop.f32.mrb[16].mxu1 }
 0x256   : > { %v2179_v36 = vpop.f32.mrb[17].mxu1 }
 0x257   : > { %v2180_v37 = vadd.f32 %v2179_v36, %v2178_v35  ;;  %v2181_v38 = vpop.f32.mrb[18].mxu1  ;;  %v333_v35 = vld [vmem:[%s2904_s5 + $0x20] sm:$0xff] }
 0x258   : > { %v2182_v39 = vpop.f32.mrb[19].mxu1 }
 0x259   : > { %v2183_v40 = vadd.f32 %v2182_v39, %v2181_v38  ;;  %2352 = vmatprep.mubr.msk.f32.mxu1 %vm699_vm0, %v2180_v37 }
 0x25b   : > { %2353 = vmatmul.mubr.msk.f32.vlgmr.msra.gmra.mrb[0].mxu1 %vm699_vm0, %v2183_v40 }
 0x25c   : > { %2377 = vmatpush3.msra.mxu1 %v2055_v56 }
 0x25d   : > { %v2184_v41 = vpop.f32.mrb[20].mxu1 }
 0x25e   : > { %v2185_v42 = vpop.f32.mrb[21].mxu1 }
 0x25f   : > { %v2186_v43 = vadd.f32 %v2185_v42, %v2184_v41  ;;  %v2187_v44 = vpop.f32.mrb[22].mxu1  ;;  %v336_v41 = vld [vmem:[%s2904_s5 + $0x38] sm:$0xff] }
 0x260   : > { %v2188_v45 = vpop.f32.mrb[23].mxu1 }
 0x261   : > { %v2189_v46 = vadd.f32 %v2188_v45, %v2187_v44  ;;  %2355 = vmatprep.mubr.msk.f32.mxu1 %vm699_vm0, %v2186_v43  ;;  %v335_v43 = vld [vmem:[%s2904_s5 + $0x30] sm:$0xff] }
 0x263   : > { %2356 = vmatmul.mubr.msk.f32.gmra.mrb[2].mxu1 %vm699_vm0, %v2189_v46 }
 0x265   : > { %v2190_v47 = vpop.f32.mrb[24].mxu1 }
 0x266   : > { %v2191_v48 = vpop.f32.mrb[25].mxu1 }
 0x267   : > { %v2192_v49 = vadd.f32 %v2191_v48, %v2190_v47  ;;  %v2193_v50 = vpop.f32.mrb[26].mxu1 }
 0x268   : > { %v2194_v51 = vpop.f32.mrb[27].mxu1 }
 0x269   : > { %v2195_v53 = vadd.f32 %v2194_v51, %v2193_v50  ;;  %2358 = vmatprep.mubr.msk.f32.mxu1 %vm699_vm0, %v2192_v49  ;;  %v338_v49 = vld [vmem:[%s2904_s5 + $0x48] sm:$0xff]  ;;  %v337_v51 = vld [vmem:[%s2904_s5 + $0x40] sm:$0xff] }
 0x26b   : > { %2359 = vmatmul.mubr.msk.f32.gmra.mrb[4].mxu1 %vm699_vm0, %v2195_v53 }
 0x26d   : > { %v2196_v54 = vpop.f32.mrb[28].mxu1 }
 0x26e   : > { %v2197_v56 = vpop.f32.mrb[29].mxu1 }
 0x26f   : > { %v2198_v57 = vadd.f32 %v2197_v56, %v2196_v54  ;;  %v2199_v58 = vpop.f32.mrb[30].mxu1 }
 0x270   : > { %v2200_v60 = vpop.f32.mrb[31].mxu1 }
 0x271   : > { %v2201_v61 = vadd.f32 %v2200_v60, %v2199_v58  ;;  %2361 = vmatprep.mubr.msk.f32.mxu1 %vm699_vm0, %v2198_v57  ;;  %v340_v60 = vld [vmem:[%s2904_s5 + $0x58] sm:$0xff] }
 0x273   : > { %2362 = vmatmul.mubr.msk.f32.gmra.mrb[6].mxu1 %vm699_vm0, %v2201_v61 }
 0x275   : > { %v2202_v63 = vpop.f32.mrb[32].mxu1 }
 0x276   : > { %v2203_v0 = vpop.f32.mrb[33].mxu1 }
 0x277   : > { %v2204_v2 = vadd.f32 %v2203_v0, %v2202_v63  ;;  %v2205_v3 = vpop.f32.mrb[34].mxu1  ;;  %v339_v63 = vld [vmem:[%s2904_s5 + $0x50] sm:$0xff] }
 0x278   : > { %v2206_v5 = vpop.f32.mrb[35].mxu1 }
 0x279   : > { %v2207_v6 = vadd.f32 %v2206_v5, %v2205_v3  ;;  %2364 = vmatprep.mubr.msk.f32.mxu1 %vm699_vm0, %v2204_v2 }
 0x27b   : > { %2365 = vmatmul.mubr.msk.f32.gmra.mrb[8].mxu1 %vm699_vm0, %v2207_v6 }
 0x27d   : > { %v2208_v7 = vpop.f32.mrb[36].mxu1 }
 0x27e   : > { %v2209_v8 = vpop.f32.mrb[37].mxu1 }
 0x27f   : > { %v2210_v10 = vadd.f32 %v2209_v8, %v2208_v7  ;;  %v2211_v17 = vpop.f32.mrb[38].mxu1  ;;  %v342_v7 = vld [vmem:[%s2904_s5 + $0x68] sm:$0xff] }
 0x280   : > { %v2212_v12 = vpop.f32.mrb[39].mxu1 }
 0x281   : > { %v2213_v19 = vadd.f32 %v2212_v12, %v2211_v17  ;;  %2367 = vmatprep.mubr.msk.f32.mxu1 %vm699_vm0, %v2210_v10  ;;  %v341_v10 = vld [vmem:[%s2904_s5 + $0x60] sm:$0xff] }
 0x283   : > { %2368 = vmatmul.mubr.msk.f32.gmra.mrb[10].mxu1 %vm699_vm0, %v2213_v19 }
 0x285   : > { %v2214_v14 = vpop.f32.mrb[40].mxu1 }
 0x286   : > { %v2215_v20 = vpop.f32.mrb[41].mxu1 }
 0x287   : > { %v2216_v21 = vadd.f32 %v2215_v20, %v2214_v14  ;;  %v2217_v22 = vpop.f32.mrb[42].mxu1 }
 0x288   : > { %v2218_v24 = vpop.f32.mrb[43].mxu1 }
 0x289   : > { %v2219_v16 = vadd.f32 %v2218_v24, %v2217_v22  ;;  %2370 = vmatprep.mubr.msk.f32.mxu1 %vm699_vm0, %v2216_v21  ;;  %v344_v21 = vld [vmem:[%s2904_s5 + $0x78] sm:$0xff]  ;;  %v343_v24 = vld [vmem:[%s2904_s5 + $0x70] sm:$0xff] }
 0x28b   : > { %2371 = vmatmul.mubr.msk.f32.gmra.mrb[12].mxu1 %vm699_vm0, %v2219_v16 }
 0x28d   : > { %v2220_v26 = vpop.f32.mrb[44].mxu1 }
 0x28e   : > { %v2221_v27 = vpop.f32.mrb[45].mxu1 }
 0x28f   : > { %v2222_v29 = vadd.f32 %v2221_v27, %v2220_v26  ;;  %v2223_v30 = vpop.f32.mrb[46].mxu1 }
 0x290   : > { %v2224_v32 = vpop.f32.mrb[47].mxu1 }
 0x291   : > { %v2225_v33 = vadd.f32 %v2224_v32, %v2223_v30  ;;  %2373 = vmatprep.mubr.msk.f32.mxu1 %vm699_vm0, %v2222_v29 }
 0x293   : > { %2374 = vmatmul.mubr.msk.f32.gmra.mrb[14].mxu1 %vm699_vm0, %v2225_v33 }
 0x294   : > { %2378 = vmatprep.mubr.msk.f32.mxu1 %vm699_vm0, %v3116_v52  ;;  %v330_v52 = vld [vmem:[%s2904_s5 + $0x8] sm:$0xff] }
 0x297   : > { %2379 = vmatmul.mubr.msk.f32.vlgmr.msra.gmra.mrb[0].mxu1 %vm699_vm0, %v3118_v55  ;;  %v329_v55 = vld [vmem:[%s2904_s5] sm:$0xff] }
 0x298   : > { %2381 = vmatprep.mubr.msk.f32.mxu1 %vm699_vm0, %v3123_v59 }
 0x29b   : > { %2382 = vmatmul.mubr.msk.f32.gmra.mrb[2].mxu1 %vm699_vm0, %v3125_v62 }
 0x29c   : > { %2384 = vmatprep.mubr.msk.f32.mxu1 %vm699_vm0, %v3127_v1 }
 0x29f   : > { %2385 = vmatmul.mubr.msk.f32.gmra.mrb[4].mxu1 %vm699_vm0, %v3129_v4 }
 0x2a0   : > { %2387 = vmatprep.mubr.msk.f32.mxu1 %vm699_vm0, %v3131_v11  ;;  %v332_v11 = vld [vmem:[%s2904_s5 + $0x18] sm:$0xff] }
 0x2a3   : > { %2388 = vmatmul.mubr.msk.f32.gmra.mrb[6].mxu1 %vm699_vm0, %v3133_v9 }
 0x2a4   : > { %2390 = vmatprep.mubr.msk.f32.mxu1 %vm699_vm0, %v3135_v18  ;;  %v331_v18 = vld [vmem:[%s2904_s5 + $0x10] sm:$0xff] }
 0x2a7   : > { %2391 = vmatmul.mubr.msk.f32.gmra.mrb[8].mxu1 %vm699_vm0, %v3137_v13 }
 0x2a8   : > { %2393 = vmatprep.mubr.msk.f32.mxu1 %vm699_vm0, %v3139_v15 }
 0x2ab   : > { %2394 = vmatmul.mubr.msk.f32.gmra.mrb[10].mxu1 %vm699_vm0, %v3141_v23 }
 0x2ac   : > { %2396 = vmatprep.mubr.msk.f32.mxu1 %vm699_vm0, %v3143_v25 }
 0x2af   : > { %2397 = vmatmul.mubr.msk.f32.gmra.mrb[12].mxu1 %vm699_vm0, %v3145_v28 }
 0x2b0   : > { %2399 = vmatprep.mubr.msk.f32.mxu1 %vm699_vm0, %v3147_v31  ;;  %v334_v31 = vld [vmem:[%s2904_s5 + $0x28] sm:$0xff]  ;;  %s2644_s5 = scalar_lea.vmem %s3240_s22, 2048 }
 0x2b1   : > { %p2645_p4 = scmp.ne.s32.totalorder %s3240_s22, %s2644_s5  ;;  %p2652_p7 = scmp.lt.s32.totalorder %s2650_s7, %s2644_s5 }
 0x2b3   : > { %2400 = vmatmul.mubr.msk.f32.gmra.mrb[14].mxu1 %vm699_vm0, %v3149_v34  ;;  %p2646_p1 = pnand %p2645_p4, %p3302_p8  ;;  %p2653_p10 = por %p2652_p7, %p2651_p6 }
 0x2b5   : > { %p2647_p5 = pneg %p2646_p1 }
 0x2b7   : > { %p2654_p13 = pnand %p2653_p10, %p2647_p5 }
 0x36a   : > { %v2380_v59 = vpop.f32.mrb[0].mxu1 }
 0x36b   : > { %v2402_v62 = vadd.f32 %v2380_v59, %v330_v52  ;;  %v1624_v1 = vpop.f32.mrb[1].mxu1 }
 0x36c   : > { %v2403_v4 = vadd.f32 %v1624_v1, %v329_v55 }
 0x36d   : > { %v1743_v9 = vmax.f32 %v2402_v62, 0.0 }
 0x36e   : > { %v1742_v13 = vmax.f32 %v2403_v4, 0.0  ;;  %v2383_v15 = vpop.f32.mrb[2].mxu1 }
 0x36f   : > { %1759 = vst [vmem:[%s3205_s11 + $0x8] sm:$0xff] %v1743_v9  ;;  %v2404_v23 = vadd.f32 %v2383_v15, %v332_v11  ;;  %v1634_v25 = vpop.f32.mrb[3].mxu1 }
 0x370   : > { %1758 = vst [vmem:[%s3205_s11] sm:$0xff] %v1742_v13  ;;  %v2405_v28 = vadd.f32 %v1634_v25, %v331_v18 }
 0x371   : > { %v1745_v34 = vmax.f32 %v2404_v23, 0.0 }
 0x372   : > { %v1744_v36 = vmax.f32 %v2405_v28, 0.0  ;;  %v2386_v37 = vpop.f32.mrb[4].mxu1 }
 0x373   : > { %1761 = vst [vmem:[%s3205_s11 + $0x18] sm:$0xff] %v1745_v34  ;;  %v2406_v38 = vadd.f32 %v2386_v37, %v334_v31  ;;  %v1644_v39 = vpop.f32.mrb[5].mxu1 }
 0x374   : > { %1760 = vst [vmem:[%s3205_s11 + $0x10] sm:$0xff] %v1744_v36  ;;  %v2407_v40 = vadd.f32 %v1644_v39, %v333_v35 }
 0x375   : > { %v1747_v42 = vmax.f32 %v2406_v38, 0.0 }
 0x376   : > { %v1746_v44 = vmax.f32 %v2407_v40, 0.0  ;;  %v2389_v45 = vpop.f32.mrb[6].mxu1 }
 0x377   : > { %1763 = vst [vmem:[%s3205_s11 + $0x28] sm:$0xff] %v1747_v42  ;;  %v2408_v46 = vadd.f32 %v2389_v45, %v336_v41  ;;  %v1654_v47 = vpop.f32.mrb[7].mxu1 }
 0x378   : > { %1762 = vst [vmem:[%s3205_s11 + $0x20] sm:$0xff] %v1746_v44  ;;  %v2409_v48 = vadd.f32 %v1654_v47, %v335_v43 }
 0x379   : > { %v1749_v50 = vmax.f32 %v2408_v46, 0.0 }
 0x37a   : > { %v1748_v53 = vmax.f32 %v2409_v48, 0.0  ;;  %v2392_v54 = vpop.f32.mrb[8].mxu1 }
 0x37b   : > { %1765 = vst [vmem:[%s3205_s11 + $0x38] sm:$0xff] %v1749_v50  ;;  %v2410_v56 = vadd.f32 %v2392_v54, %v338_v49  ;;  %v1664_v57 = vpop.f32.mrb[9].mxu1 }
 0x37c   : > { %1764 = vst [vmem:[%s3205_s11 + $0x30] sm:$0xff] %v1748_v53  ;;  %v2411_v58 = vadd.f32 %v1664_v57, %v337_v51 }
 0x37d   : > { %v1751_v61 = vmax.f32 %v2410_v56, 0.0 }
 0x37e   : > { %v1750_v0 = vmax.f32 %v2411_v58, 0.0  ;;  %v2395_v2 = vpop.f32.mrb[10].mxu1 }
 0x37f   : > { %1767 = vst [vmem:[%s3205_s11 + $0x48] sm:$0xff] %v1751_v61  ;;  %v2412_v3 = vadd.f32 %v2395_v2, %v340_v60  ;;  %v1674_v5 = vpop.f32.mrb[11].mxu1 }
 0x380   : > { %1766 = vst [vmem:[%s3205_s11 + $0x40] sm:$0xff] %v1750_v0  ;;  %v2413_v6 = vadd.f32 %v1674_v5, %v339_v63 }
 0x381   : > { %v1753_v8 = vmax.f32 %v2412_v3, 0.0 }
 0x382   : > { %v1752_v17 = vmax.f32 %v2413_v6, 0.0  ;;  %v2398_v12 = vpop.f32.mrb[12].mxu1 }
 0x383   : > { %1769 = vst [vmem:[%s3205_s11 + $0x58] sm:$0xff] %v1753_v8  ;;  %v2414_v19 = vadd.f32 %v2398_v12, %v342_v7  ;;  %v1684_v14 = vpop.f32.mrb[13].mxu1 }
 0x384   : > { %1768 = vst [vmem:[%s3205_s11 + $0x50] sm:$0xff] %v1752_v17  ;;  %v2415_v20 = vadd.f32 %v1684_v14, %v341_v10 }
 0x385   : > { %v1755_v22 = vmax.f32 %v2414_v19, 0.0 }
 0x386   : > { %v1754_v16 = vmax.f32 %v2415_v20, 0.0  ;;  %v2401_v26 = vpop.f32.mrb[14].mxu1 }
 0x387   : > { %1771 = vst [vmem:[%s3205_s11 + $0x68] sm:$0xff] %v1755_v22  ;;  %v2416_v27 = vadd.f32 %v2401_v26, %v344_v21  ;;  %v1694_v29 = vpop.f32.mrb[15].mxu1 }
 0x388   : > { %1770 = vst [vmem:[%s3205_s11 + $0x60] sm:$0xff] %v1754_v16  ;;  %v2417_v30 = vadd.f32 %v1694_v29, %v343_v24 }
 0x389   : > { %v1757_v32 = vmax.f32 %v2416_v27, 0.0 }
 0x38a   : > { %v1756_v33 = vmax.f32 %v2417_v30, 0.0 }
 0x38b   : > { %1773 = vst [vmem:[%s3205_s11 + $0x78] sm:$0xff] %v1757_v32 }
 0x38c   : > { %1772 = vst [vmem:[%s3205_s11 + $0x70] sm:$0xff] %v1756_v33 }
 0x38d   : > { %2657 = shalt.err (!%p2654_p13)
}
 0x38e   : > { %s2658_s13 = scalar_lea.hbm %s3238_s8, 2048  ;;  %s2662_s21 = scalar_lea.hbm %s3295_s4, 4096 }
 0x38f   : > { %p2659_p0 = scmp.ne.s32.totalorder %s3238_s8, %s2658_s13  ;;  %p2663_p9 = scmp.lt.u32.totalorder %s3238_s8, %s3295_s4 }
 0x390   : > { %p2664_p11 = scmp.lt.u32.totalorder %s2662_s21, %s2658_s13  ;;  %p2666_p4 = scmp.lt.u32.totalorder %s2658_s13, %s3238_s8 }
 0x391   : > { %p2660_p2 = pnand %p2659_p0, %p3302_p8 }
 0x392   : > { %p2665_p12 = por %p2664_p11, %p2663_p9 }
 0x393   : > { %p2661_p3 = pneg %p2660_p2 }
 0x394   : > { %p2667_p1 = por %p2666_p4, %p2665_p12 }
 0x396   : > { %p2668_p5 = pnand %p2667_p1, %p2661_p3 }
 0x398   : > { %2671 = shalt.err (!%p2668_p5)
}
 0x399   : > { %s2742_s12 = smov 128   ;;  %s2743_s26 = smov 8  }
 0x39a   : > { %2463 = dma.vmem_to_hbm [thread:$0]  (%p3302_p8), %s3240_s22, 2048, %s3238_s8, %s1775_s18, %s2742_s12, %s2742_s12, %s2743_s26  }
 0x39b PF: > { %s1803_s6 = sand.u32 1, %s2710_s15   ;;  %p3303_p6 = scmp.ne.s32.totalorder %s3301_s30, 0 }
 0x39c   : > { %p3304_p7 = scmp.ge.s32.totalorder %s2730_s20, 2  ;;  %s1804_s5 = scalar_lea.sflag [#allocation4], %s1803_s6 }
 0x39e   : > { %p2466_p10 = pnand %p3304_p7, %p3303_p6 }
 0x3a0   : > { %2705 = dma.done.wait (!%p2466_p10), %s1804_s5, 2048  }
 0x3a1   : > { %2707 = vsyncadd (!%p2466_p10), %s1804_s5, 4294965248  ;;  %s23_s20 = sadd.s32 1, %s2730_s20   ;;  %s3305_s15 = smov %s2714_s16 }
 0x3a2   : > { %p20_p13 = scmp.ge.s32.totalorder %s23_s20, 4   ;;  %s3306_s16 = smov %s2718_s17 }
 0x3a3   : > { %s3307_s17 = smov %s2825_s29  ;;  %s3308_s18 = smov %s2726_s19 }
 0x3a4   : > { %s3309_s19 = smov %s3311_s23  ;;  %22 = sbr.rel (!%p20_p13) target bundleno = 8 (0x8), region = 118 }
 0x3ab   :  { %1809 = vsyncpa [#allocation3], 1 }
 0x3ac   :  { %1811 = vsyncpa [#allocation3 + $0x1], 1 }
 0x3ad   :  { %1812 = vsyncpa [#allocation6], 1 }
 0x3ae   :  { %1814 = vsyncpa [#allocation6 + $0x1], 1 }
 0x3af   :  { %1815 = vsyncpa [#allocation4], 1 }
 0x3b0   :  { %1817 = vsyncpa [#allocation4 + $0x1], 1 }

</bundles_post_ra>
